<compile_context>
chip_gen: v7x
topology: tpu7x:2x2x1
jax: 0.10.0
libtpu: 0.0.40
codegen_flags: <defaults>
</compile_context>

<pallas_src>
import math
import functools

import jax
import jax.numpy as jnp
from jax.experimental import pallas as pl
from jax.experimental.pallas import tpu as pltpu

_LANE = 128
_SUB = 8
_MAX_BLOCK_ROWS = 1024  # (1024,128) f32 block = 512 KiB/input; x2 inputs x2 bufs = 2 MiB VMEM


def _hdr_loss_kernel(pred_ref, label_ref, out_ref, *, mu, block_rows,
                     valid_rows, needs_mask):
    p = pred_ref[...].astype(jnp.float32)
    l = label_ref[...].astype(jnp.float32)
    # |c*a - c*b| = c*|a - b| with c = 1/log(1+mu) applied on the host side.
    d = jnp.abs(jnp.log1p(mu * p) - jnp.log1p(mu * l))
    if needs_mask:
        # Last grid block may read past the end of the (padded) array; zero
        # out the garbage rows before accumulating (select, so NaNs are safe).
        row = jax.lax.broadcasted_iota(jnp.int32, (block_rows, _LANE), 0)
        global_row = pl.program_id(0) * block_rows + row
        d = jnp.where(global_row < valid_rows, d, 0.0)
    # Fold sublane-groups onto each other: (block_rows,128) ->
    # (block_rows//8, 8, 128), sum over the major axis (pure vreg adds).
    out_ref[...] = jnp.sum(d.reshape(block_rows // _SUB, _SUB, _LANE), axis=0)


def hdr_loss(pred, label, mu=5000, max_block_rows=_MAX_BLOCK_ROWS):
    """Pallas implementation of HDRloss.forward(pred, label)."""
    assert pred.shape == label.shape
    total = pred.size
    mu = float(mu)

    flat_p = pred.reshape(-1)
    flat_l = label.reshape(-1)

    # Zero-pad only up to the next 8*128 boundary; zeros contribute
    # |log1p(0) - log1p(0)| = 0.  For typical NCHW image tensors this branch
    # is skipped entirely (no host-side copy, native dtype passthrough).
    tile = _SUB * _LANE
    rem = total % tile
    if rem:
        flat_p = jnp.pad(flat_p, (0, tile - rem))
        flat_l = jnp.pad(flat_l, (0, tile - rem))
    rows = flat_p.shape[0] // _LANE

    p2 = flat_p.reshape(rows, _LANE)
    l2 = flat_l.reshape(rows, _LANE)

    block_rows = rows if rows <= max_block_rows else max_block_rows
    grid = pl.cdiv(rows, block_rows)
    needs_mask = (rows % block_rows) != 0

    kernel = functools.partial(
        _hdr_loss_kernel,
        mu=mu,
        block_rows=block_rows,
        valid_rows=rows,
        needs_mask=needs_mask,
    )

    partials = pl.pallas_call(
        kernel,
        out_shape=jax.ShapeDtypeStruct((grid * _SUB, _LANE), jnp.float32),
        grid_spec=pltpu.PrefetchScalarGridSpec(
            num_scalar_prefetch=0,
            grid=(grid,),
            in_specs=[
                pl.BlockSpec((block_rows, _LANE), lambda i: (i, 0)),
                pl.BlockSpec((block_rows, _LANE), lambda i: (i, 0)),
            ],
            out_specs=pl.BlockSpec((_SUB, _LANE), lambda i: (i, 0)),
        ),
        compiler_params=pltpu.CompilerParams(
            dimension_semantics=("parallel",),
        ),
    )(p2, l2)

    # Tiny final reduction + scale (mean over the true element count and the
    # hoisted 1/log(1+mu) factor).
    return jnp.sum(partials) / (total * math.log1p(mu))


def _hdr_loss_ref(pred, label, mu=5000):
    c = lambda x: jnp.log(1.0 + mu * x) / math.log(1.0 + mu)
    return jnp.mean(jnp.abs(c(pred) - c(label)))


if __name__ == "__main__":
    key = jax.random.PRNGKey(0)
    k1, k2, k3, k4 = jax.random.split(key, 4)

    # Primary test: NCHW image-like inputs (aligned path: no host pad/cast).
    pred = jax.random.uniform(k1, (2, 4, 16, 16), dtype=jnp.float32)
    label = jax.random.uniform(k2, (2, 4, 16, 16), dtype=jnp.float32)
    loss = hdr_loss(pred, label, mu=5000)
    jax.block_until_ready(loss)
    ref = _hdr_loss_ref(pred, label, mu=5000)
    assert jnp.allclose(loss, ref, rtol=1e-5, atol=1e-6), (loss, ref)

    # Secondary test: ragged size exercising the tail-pad and partial-block
    # mask paths (small block override keeps shapes tiny).
    pred2 = jax.random.uniform(k3, (1, 3, 25, 31), dtype=jnp.float32)
    label2 = jax.random.uniform(k4, (1, 3, 25, 31), dtype=jnp.float32)
    loss2 = hdr_loss(pred2, label2, mu=5000, max_block_rows=16)
    jax.block_until_ready(loss2)
    ref2 = _hdr_loss_ref(pred2, label2, mu=5000)
    assert jnp.allclose(loss2, ref2, rtol=1e-4, atol=1e-6), (loss2, ref2)

    print("KERNEL_OK")
</pallas_src>

<mosaic_0001>
module attributes {stable_mosaic.version = 11 : i64} {
  func.func @_hdr_loss_kernel(%arg0: i32, %arg1: memref<16x128xf32, #tpu.memory_space<vmem>>, %arg2: memref<16x128xf32, #tpu.memory_space<vmem>>, %arg3: memref<8x128xf32, #tpu.memory_space<vmem>>) attributes {dimension_semantics = [#tpu.dimension_semantics<parallel>], iteration_bounds = array<i64: 1>, scalar_prefetch = 0 : i64, scratch_operands = 0 : i64, tpu.core_type = #tpu.core_type<tc>, window_params = [{transform_indices = @transform_0, window_bounds = array<i64: 16, 128>}, {transform_indices = @transform_1, window_bounds = array<i64: 16, 128>}, {transform_indices = @transform_2, window_bounds = array<i64: 8, 128>}]} {
    %c0 = arith.constant 0 : index
    %c0_0 = arith.constant 0 : index
    %0 = vector.load %arg1[%c0, %c0_0] : memref<16x128xf32, #tpu.memory_space<vmem>>, vector<16x128xf32>
    %c0_1 = arith.constant 0 : index
    %c0_2 = arith.constant 0 : index
    %1 = vector.load %arg2[%c0_1, %c0_2] : memref<16x128xf32, #tpu.memory_space<vmem>>, vector<16x128xf32>
    %cst = arith.constant 5.000000e+03 : f32
    %2 = vector.broadcast %cst : f32 to vector<16x128xf32>
    %3 = arith.mulf %2, %0 : vector<16x128xf32>
    %4 = math.log1p %3 : vector<16x128xf32>
    %cst_3 = arith.constant 5.000000e+03 : f32
    %5 = vector.broadcast %cst_3 : f32 to vector<16x128xf32>
    %6 = arith.mulf %5, %1 : vector<16x128xf32>
    %7 = math.log1p %6 : vector<16x128xf32>
    %8 = arith.subf %4, %7 : vector<16x128xf32>
    %9 = math.absf %8 : vector<16x128xf32>
    %10 = vector.shape_cast %9 : vector<16x128xf32> to vector<2x8x128xf32>
    %cst_4 = arith.constant dense<0.000000e+00> : vector<8x128xf32>
    %11 = vector.multi_reduction <add>, %10, %cst_4 [0] : vector<2x8x128xf32> to vector<8x128xf32>
    %c0_5 = arith.constant 0 : index
    %c0_6 = arith.constant 0 : index
    %12 = vector.load %arg3[%c0_5, %c0_6] : memref<8x128xf32, #tpu.memory_space<vmem>>, vector<8x128xf32>
    tpu.vector_store %arg3[%c0_5, %c0_6], %11 {strides = array<i32>} : memref<8x128xf32, #tpu.memory_space<vmem>>, vector<8x128xf32>,
    return
  }
  func.func @transform_0(%arg0: i32) -> (i32, i32) {
    %c0_i32 = arith.constant 0 : i32
    %c0_i32_0 = arith.constant 0 : i32
    return %arg0, %c0_i32 : i32, i32
  }
  func.func @transform_1(%arg0: i32) -> (i32, i32) {
    %c0_i32 = arith.constant 0 : i32
    %c0_i32_0 = arith.constant 0 : i32
    return %arg0, %c0_i32 : i32, i32
  }
  func.func @transform_2(%arg0: i32) -> (i32, i32) {
    %c0_i32 = arith.constant 0 : i32
    %c0_i32_0 = arith.constant 0 : i32
    return %arg0, %c0_i32 : i32, i32
  }
}

</mosaic_0001>

<bundles_post_ra>
// kernel: tpu_custom_call.1
= control target key start
LH: loop header
LB: loop body
LE: loop exit
PB: predicated region body
PF: predicated region fallthrough
CT: control target
= control target key end

     0   :  { %7 = vsyncpa [#allocation3], 0  ;;  %s253_s0 = inlined_call_operand.hbm [shape: f32[16,128], index: 0, kind: input, shape index: {}]   ;;  %s254_s1 = inlined_call_operand.hbm [shape: f32[16,128], index: 1, kind: input, shape index: {}]   ;;  %s255_s2 = inlined_call_operand.hbm [shape: f32[8,128], index: 2, kind: output, shape index: {}]  }
   0x1   :  { %8 = vsyncpa [#allocation6], 0 }
   0x2   :  { %9 = vsyncpa [#allocation4], 0  ;;  %s191_s9 = smov [#allocation2]   ;;  %s119_s13 = scalar_lea.hbm %s253_s0, 256 }
   0x3   :  { %s15_s10 = sshll.u32 %s191_s9, 4  ;;  %p120_p0 = scmp.ne.s32.totalorder %s253_s0, %s119_s13  ;;  %s16_s10 = int_to_ptr.vmem [resolvable:$true] %s15_s10 }
   0x4   :  { %p123_p1 = scmp.lt.u32.totalorder %s119_s13, %s253_s0 }
   0x6   :  { %p125_p2 = pnand %p123_p1, %p120_p0 }
   0x8   :  { %128 = shalt.err (!%p125_p2)
}
   0x9   :  { %s129_s18 = scalar_lea.vmem %s16_s10, 256  ;;  %p134_p4 = scmp.lt.s32.totalorder %s16_s10, %s16_s10 }
   0xa   :  { %p130_p3 = scmp.ne.s32.totalorder %s16_s10, %s129_s18  ;;  %p135_p5 = scmp.lt.s32.totalorder %s129_s18, %s129_s18 }
   0xc   :  { %p136_p6 = por %p135_p5, %p134_p4 }
   0xe   :  { %p137_p7 = pnand %p136_p6, %p130_p3 }
  0x10   :  { %140 = shalt.err (!%p137_p7)
}
  0x11   :  { %s192_s19 = smov 128   ;;  %s193_s20 = smov 8  }
  0x12   :  { %21 = dma.hbm_to_vmem [thread:$0]  %s253_s0, 256, %s16_s10, [#allocation3], %s192_s19, %s192_s19, %s193_s20  }
  0x13   :  { %s194_s23 = smov [#allocation5]   ;;  %s141_s27 = scalar_lea.hbm %s254_s1, 256 }
  0x14   :  { %s27_s24 = sshll.u32 %s194_s23, 4  ;;  %p142_p8 = scmp.ne.s32.totalorder %s254_s1, %s141_s27  ;;  %s28_s24 = int_to_ptr.vmem [resolvable:$true] %s27_s24 }
  0x15   :  { %p145_p9 = scmp.lt.u32.totalorder %s141_s27, %s254_s1 }
  0x17   :  { %p147_p10 = pnand %p145_p9, %p142_p8 }
  0x19   :  { %150 = shalt.err (!%p147_p10)
}
  0x1a   :  { %s151_s4 = scalar_lea.vmem %s28_s24, 256  ;;  %p156_p12 = scmp.lt.s32.totalorder %s28_s24, %s28_s24 }
  0x1b   :  { %p152_p11 = scmp.ne.s32.totalorder %s28_s24, %s151_s4  ;;  %p157_p13 = scmp.lt.s32.totalorder %s151_s4, %s151_s4 }
  0x1d   :  { %p158_p0 = por %p157_p13, %p156_p12 }
  0x1f   :  { %p159_p1 = pnand %p158_p0, %p152_p11 }
  0x21   :  { %162 = shalt.err (!%p159_p1)
}
  0x22   :  { %33 = dma.hbm_to_vmem [thread:$0]  %s254_s1, 256, %s28_s24, [#allocation6], %s192_s19, %s192_s19, %s193_s20  }
  0x23   :  { %185 = dma.done.wait [#allocation3], 256  }
  0x24   :  { %186 = vsyncadd [#allocation3], 4294967040 }
  0x25   :  { %187 = dma.done.wait [#allocation6], 256  }
  0x26   :  { %188 = vsyncadd [#allocation6], 4294967040  ;;  %v40_v0 = vld [vmem:[#allocation2] sm:$0xff]  ;;  %v41_v1 = vld [vmem:[#allocation2 + $0x8] sm:$0xff]  ;;  %s195_s1 = smov [#allocation7]  }
  0x27   :  { %v42_v2 = vld [vmem:[#allocation5] sm:$0xff]  ;;  %v43_v3 = vld [vmem:[#allocation5 + $0x8] sm:$0xff]  ;;  %v44_v4 = vmul.f32 5000.0, %v40_v0  ;;  %v45_v5 = vmul.f32 5000.0, %v41_v1  ;;  %s96_s6 = sshll.u32 %s195_s1, 4  ;;  %s97_s6 = int_to_ptr.vmem [resolvable:$true] %s96_s6 }
  0x28   :  { %v64_v6 = vmul.f32 5000.0, %v42_v2  ;;  %v65_v9 = vmul.f32 5000.0, %v43_v3  ;;  %s163_s7 = scalar_lea.vmem %s97_s6, 128  ;;  %p168_p3 = scmp.lt.s32.totalorder %s97_s6, %s97_s6 }
  0x29   :  { %v46_v7 = vadd.f32 1.0, %v44_v4  ;;  %v55_v8 = vadd.f32 1.0, %v45_v5  ;;  %v49_v11 = vmul.f32 -0.5, %v44_v4  ;;  %v58_v13 = vmul.f32 -0.5, %v45_v5  ;;  %p164_p2 = scmp.ne.s32.totalorder %s97_s6, %s163_s7  ;;  %p169_p4 = scmp.lt.s32.totalorder %s163_s7, %s163_s7 }
  0x2a   :  { %v66_v10 = vadd.f32 1.0, %v64_v6  ;;  %v75_v12 = vadd.f32 1.0, %v65_v9  ;;  %v69_v14 = vmul.f32 -0.5, %v64_v6  ;;  %v78_v16 = vmul.f32 -0.5, %v65_v9 }
  0x2b   :  { %111 = vlog2.f32 %v46_v7  ;;  %v50_v15 = vadd.f32 1.0, %v49_v11  ;;  %v52_v17 = vand.u32 2147483647, %v44_v4  ;;  %v59_v18 = vadd.f32 1.0, %v58_v13  ;;  %p170_p5 = por %p169_p4, %p168_p3 }
  0x2c   :  { %113 = vlog2.f32 %v55_v8  ;;  %v70_v19 = vadd.f32 1.0, %v69_v14  ;;  %v61_v20 = vand.u32 2147483647, %v45_v5  ;;  %v72_v21 = vand.u32 2147483647, %v64_v6 }
  0x2d   :  { %115 = vlog2.f32 %v66_v10  ;;  %v51_v22 = vmul.f32 %v50_v15, %v44_v4  ;;  %v79_v23 = vadd.f32 1.0, %v78_v16  ;;  %vm235_vm0 = vcmp.lt.f32.partialorder %v52_v17, 0.0004427343  ;;  %p171_p6 = pnand %p170_p5, %p164_p2 }
  0x2e   :  { %117 = vlog2.f32 %v75_v12  ;;  %v81_v26 = vand.u32 2147483647, %v65_v9  ;;  %v60_v29 = vmul.f32 %v59_v18, %v45_v5  ;;  %v71_v30 = vmul.f32 %v70_v19, %v64_v6 }
  0x2f   :  { %vm62_vm1 = vcmp.lt.f32.partialorder %v61_v20, 0.0004427343  ;;  %vm73_vm2 = vcmp.lt.f32.partialorder %v72_v21, 0.0004427343  ;;  %v80_v35 = vmul.f32 %v79_v23, %v65_v9 }
  0x30   :  { %vm82_vm3 = vcmp.lt.f32.partialorder %v81_v26, 0.0004427343 }
  0x35   :  { %v112_v24 = vpop.eup %111 }
  0x36   :  { %v114_v27 = vpop.eup %113  ;;  %v48_v28 = vmul.f32 0.6931472, %v112_v24 }
  0x37   :  { %v116_v31 = vpop.eup %115  ;;  %v57_v32 = vmul.f32 0.6931472, %v114_v27 }
  0x38   :  { %v54_v33 = vsel %vm235_vm0, %v51_v22, %v48_v28  ;;  %v68_v34 = vmul.f32 0.6931472, %v116_v31  ;;  %v118_v36 = vpop.eup %117 }
  0x39   :  { %v63_v37 = vsel %vm62_vm1, %v60_v29, %v57_v32  ;;  %v77_v39 = vmul.f32 0.6931472, %v118_v36 }
  0x3a   :  { %v74_v38 = vsel %vm73_vm2, %v71_v30, %v68_v34 }
  0x3b   :  { %v84_v40 = vsub.f32 %v54_v33, %v74_v38  ;;  %v83_v41 = vsel %vm82_vm3, %v80_v35, %v77_v39 }
  0x3c   :  { %v85_v42 = vsub.f32 %v63_v37, %v83_v41 }
  0x3d   :  { %v86_v43 = vand.u32 2147483647, %v84_v40 }
  0x3e   :  { %v87_v44 = vand.u32 2147483647, %v85_v42 }
  0x40   :  { %v88_v45 = vadd.f32 %v87_v44, %v86_v43 }
  0x42   :  { %89 = vst [vmem:[#allocation7] sm:$0xff] %v88_v45 }
  0x43   :  { %174 = shalt.err (!%p171_p6)
}
  0x44   :  { %s175_s10 = scalar_lea.hbm %s255_s2, 128 }
  0x45   :  { %p176_p7 = scmp.ne.s32.totalorder %s255_s2, %s175_s10  ;;  %p179_p8 = scmp.lt.u32.totalorder %s175_s10, %s255_s2 }
  0x47   :  { %p181_p9 = pnand %p179_p8, %p176_p7 }
  0x49   :  { %184 = shalt.err (!%p181_p9)
}
  0x4a   :  { %99 = dma.vmem_to_hbm [thread:$0]  %s97_s6, 128, %s255_s2, [#allocation4]  }
  0x4b   :  { %189 = dma.done.wait [#allocation4], 128  }
  0x4c   :  { %190 = vsyncadd [#allocation4], 4294967168 }
  0x4d   :  { %103 = vsyncpa [#allocation3], 1 }
  0x4e   :  { %104 = vsyncpa [#allocation6], 1 }
  0x4f   :  { %105 = vsyncpa [#allocation4], 1 }

</bundles_post_ra>
